<compile_context>
chip_gen: v5e
topology: v5e:2x2
jax: 0.10.0
libtpu: 0.0.40
codegen_flags: <defaults>
</compile_context>

<pallas_src>
import jax
import jax.numpy as jnp
from jax.experimental import pallas as pl
from jax.experimental.pallas import tpu as pltpu


def _round_up(x, m):
    return (x + m - 1) // m * m


def sae_kernel(x_ref,
               w1_ref, b1_ref,
               w2_ref, b2_ref,
               w3_ref, b3_ref,
               w4_ref, b4_ref,
               o_ref):
    # x tile: [TB, M] f32; cast to bf16 in-kernel (VPU cast hides under the
    # DMA) so the wide fc1 matmul runs bf16 x bf16 -> f32 accumulate on MXU.
    x = x_ref[...].astype(jnp.bfloat16)

    # fc1 + sigmoid
    h1 = jnp.dot(x, w1_ref[...], preferred_element_type=jnp.float32) + b1_ref[...]
    h1 = jax.nn.sigmoid(h1)

    # fc2 + sigmoid (tiny, f32)
    h2 = jnp.dot(h1, w2_ref[...], preferred_element_type=jnp.float32) + b2_ref[...]
    h2 = jax.nn.sigmoid(h2)

    # fc3 + sigmoid (tiny, f32)
    h3 = jnp.dot(h2, w3_ref[...], preferred_element_type=jnp.float32) + b3_ref[...]
    h3 = jax.nn.sigmoid(h3)

    # fc4 (no activation); bf16 x bf16 -> f32 accumulate
    out = jnp.dot(h3.astype(jnp.bfloat16), w4_ref[...],
                  preferred_element_type=jnp.float32) + b4_ref[...]

    o_ref[...] = out.astype(o_ref.dtype)


def prepare_params(params):
    """One-time parameter prep: cast the two big weights to bf16.

    Hoisted out of the per-call forward so the casts are not re-run every
    invocation.  Weights are stored [in, out]; biases [1, out].
    """
    (w1, b1), (w2, b2), (w3, b3), (w4, b4) = (
        params["fc1"], params["fc2"], params["fc3"], params["fc4"])
    return {
        "fc1": (w1.astype(jnp.bfloat16), b1),
        "fc2": (w2, b2),
        "fc3": (w3, b3),
        "fc4": (w4.astype(jnp.bfloat16), b4),
    }


def _vmem_budget_bytes():
    # ~3/4 of physical VMEM per TensorCore; fallback (48 MiB) is safe on every
    # generation (v7x: 64 MiB/TC, v5e/v6e: 128 MiB).
    try:
        cap = int(pltpu.get_tpu_info().vmem_capacity_bytes)
    except Exception:
        cap = 64 << 20
    return (cap * 3) // 4


def _resident(arr):
    # Whole array VMEM-resident: block == full array, constant block index.
    n = arr.ndim
    return pl.BlockSpec(arr.shape, lambda i, _n=n: (0,) * _n)


def sae_forward(x, prepared, *, tb_max=None, out_dtype=jnp.float32):
    """Fused SAE forward.  x: [B, nb_movies] f32, unpadded.

    `prepared` comes from `prepare_params` (W1/W4 bf16, rest f32).
    Returns [B, nb_movies] in `out_dtype` (f32 default; bf16 halves output
    HBM traffic on mem-bound v5e/v6e at ~0.4% relative error).
    """
    B, M = x.shape
    (w1, b1), (w2, b2), (w3, b3), (w4, b4) = (
        prepared["fc1"], prepared["fc2"], prepared["fc3"], prepared["fc4"])
    H1, H2, H3 = w1.shape[1], w2.shape[1], w3.shape[1]
    out_itemsize = jnp.dtype(out_dtype).itemsize

    # ---- Batch tile sized from the actual VMEM footprint -------------------
    budget = _vmem_budget_bytes()
    small_bytes = 4 * (w2.size + w3.size + b1.size + b2.size + b3.size + b4.size)
    # Resident operands still get 2 pipeline buffers each.
    weight_bytes = 2 * (2 * w1.size + 2 * w4.size + small_bytes)
    # Per batch-row bytes over the feature dim: double-buffered f32 x (8*M)
    # + double-buffered out (2*itemsize*M) + in-kernel temps (bf16 x copy and
    # f32 fc4 result, ~10*M, conservative).
    bytes_per_row = (8 + 2 * out_itemsize + 10) * M
    tile_budget = max(budget - weight_bytes - (2 << 20), 8 * bytes_per_row)
    tb = max(8, tile_budget // bytes_per_row)
    tb = (tb // 256) * 256 if tb >= 256 else (tb // 8) * 8   # MXU-friendly M tiles
    # >= 2 grid steps whenever the batch allows, so both v7x TensorCores get
    # work under dimension_semantics=("parallel",).  v5e/v6e unaffected.
    tb = min(tb, max(8, _round_up(pl.cdiv(B, 2), 8)))
    tb = min(tb, _round_up(B, 8))
    if tb_max is not None:
        tb = min(tb, max(8, (tb_max // 8) * 8))
    if B < 8:
        tb = B                       # block == full (short) batch dim
    grid = (pl.cdiv(B, tb),)         # uneven last block: OOB rows are dropped

    # ---- Advisory cost hint for XLA's scheduler -----------------------------
    flops = 2 * B * (M * H1 + H1 * H2 + H2 * H3 + H3 * M)
    transcendentals = B * (H1 + H2 + H3)
    bytes_accessed = (B * M * (4 + out_itemsize)
                      + 2 * (w1.size + w4.size) + small_bytes)
    cost = pl.CostEstimate(flops=int(flops),
                           transcendentals=int(transcendentals),
                           bytes_accessed=int(bytes_accessed))

    return pl.pallas_call(
        sae_kernel,
        out_shape=jax.ShapeDtypeStruct((B, M), out_dtype),
        grid=grid,
        in_specs=[
            pl.BlockSpec((tb, M), lambda i: (i, 0)),   # x: batch-tiled, unpadded
            _resident(w1), _resident(b1),
            _resident(w2), _resident(b2),
            _resident(w3), _resident(b3),
            _resident(w4), _resident(b4),
        ],
        out_specs=pl.BlockSpec((tb, M), lambda i: (i, 0)),
        compiler_params=pltpu.CompilerParams(
            dimension_semantics=("parallel",),
            vmem_limit_bytes=int(budget),
        ),
        cost_estimate=cost,
    )(x, w1, b1, w2, b2, w3, b3, w4, b4)


def init_linear(key, fan_in, fan_out):
    """Deterministic nn.Linear-style init: U(-1/sqrt(fan_in), 1/sqrt(fan_in)).

    Returned weight is already transposed to [in, out]; bias is [1, out].
    """
    kw, kb = jax.random.split(key)
    bound = 1.0 / jnp.sqrt(jnp.float32(fan_in))
    w = jax.random.uniform(kw, (fan_in, fan_out), jnp.float32, -bound, bound)
    b = jax.random.uniform(kb, (1, fan_out), jnp.float32, -bound, bound)
    return w, b


def sae_reference(x, prepared):
    """Pure-JAX reference mirroring the kernel's bf16 casts for x/W1/W4/h3."""
    (w1, b1), (w2, b2), (w3, b3), (w4, b4) = (
        prepared["fc1"], prepared["fc2"], prepared["fc3"], prepared["fc4"])
    xb = x.astype(jnp.bfloat16).astype(jnp.float32)
    h = jax.nn.sigmoid(xb @ w1.astype(jnp.float32) + b1)
    h = jax.nn.sigmoid(h @ w2 + b2)
    h = jax.nn.sigmoid(h @ w3 + b3)
    hb = h.astype(jnp.bfloat16).astype(jnp.float32)
    return hb @ w4.astype(jnp.float32) + b4


if __name__ == "__main__":
    # Small synthetic shapes consistent with the module: nb_movies is the
    # input/output feature dim (real datasets: MovieLens ~3952, Netflix ~17770).
    batch = 32
    nb_movies = 64

    key = jax.random.PRNGKey(0)
    k_x, k1, k2, k3, k4 = jax.random.split(key, 5)

    params = {
        "fc1": init_linear(k1, nb_movies, 20),
        "fc2": init_linear(k2, 20, 10),
        "fc3": init_linear(k3, 10, 20),
        "fc4": init_linear(k4, 20, nb_movies),
    }
    prepared = prepare_params(params)

    # Ratings-like input in [0, 5].
    x = jax.random.uniform(k_x, (batch, nb_movies), jnp.float32, 0.0, 5.0)

    ref = sae_reference(x, prepared)

    # (1) Auto-sized tile: VMEM-derived TB clamped to give >= 2 grid steps
    #     (both v7x TensorCores busy) -> TB=16, grid=(2,).
    out = jax.block_until_ready(sae_forward(x, prepared))
    assert out.shape == (batch, nb_movies)
    assert out.dtype == jnp.float32
    assert jnp.allclose(out, ref, atol=2e-3, rtol=2e-3), "mismatch (auto tile)"

    # (2) Forced small tile exercising a longer pipelined grid: TB=8, grid=(4,).
    out_small = jax.block_until_ready(sae_forward(x, prepared, tb_max=8))
    assert jnp.allclose(out_small, ref, atol=2e-3, rtol=2e-3), "mismatch (tb=8)"

    print("KERNEL_OK")
</pallas_src>

<mosaic_0001>
module attributes {stable_mosaic.version = 11 : i64} {
  func.func @sae_kernel(%arg0: i32, %arg1: memref<16x64xf32, #tpu.memory_space<vmem>>, %arg2: memref<64x20xbf16, #tpu.memory_space<vmem>>, %arg3: memref<1x20xf32, #tpu.memory_space<vmem>>, %arg4: memref<20x10xf32, #tpu.memory_space<vmem>>, %arg5: memref<1x10xf32, #tpu.memory_space<vmem>>, %arg6: memref<10x20xf32, #tpu.memory_space<vmem>>, %arg7: memref<1x20xf32, #tpu.memory_space<vmem>>, %arg8: memref<20x64xbf16, #tpu.memory_space<vmem>>, %arg9: memref<1x64xf32, #tpu.memory_space<vmem>>, %arg10: memref<16x64xf32, #tpu.memory_space<vmem>>) attributes {dimension_semantics = [#tpu.dimension_semantics<parallel>], iteration_bounds = array<i64: 2>, scalar_prefetch = 0 : i64, scratch_operands = 0 : i64, tpu.core_type = #tpu.core_type<tc>, window_params = [{transform_indices = @transform_0, window_bounds = array<i64: 16, 64>}, {pipeline_mode = #tpu.pipeline_mode<synchronous>, transform_indices = @transform_1, window_bounds = array<i64: 64, 20>}, {pipeline_mode = #tpu.pipeline_mode<synchronous>, transform_indices = @transform_2, window_bounds = array<i64: 1, 20>}, {pipeline_mode = #tpu.pipeline_mode<synchronous>, transform_indices = @transform_3, window_bounds = array<i64: 20, 10>}, {pipeline_mode = #tpu.pipeline_mode<synchronous>, transform_indices = @transform_4, window_bounds = array<i64: 1, 10>}, {pipeline_mode = #tpu.pipeline_mode<synchronous>, transform_indices = @transform_5, window_bounds = array<i64: 10, 20>}, {pipeline_mode = #tpu.pipeline_mode<synchronous>, transform_indices = @transform_6, window_bounds = array<i64: 1, 20>}, {pipeline_mode = #tpu.pipeline_mode<synchronous>, transform_indices = @transform_7, window_bounds = array<i64: 20, 64>}, {pipeline_mode = #tpu.pipeline_mode<synchronous>, transform_indices = @transform_8, window_bounds = array<i64: 1, 64>}, {transform_indices = @transform_9, window_bounds = array<i64: 16, 64>}]} {
    %c0 = arith.constant 0 : index
    %c0_0 = arith.constant 0 : index
    %0 = vector.load %arg1[%c0, %c0_0] : memref<16x64xf32, #tpu.memory_space<vmem>>, vector<16x64xf32>
    %1 = arith.truncf %0 : vector<16x64xf32> to vector<16x64xbf16>
    %c0_1 = arith.constant 0 : index
    %c0_2 = arith.constant 0 : index
    %2 = vector.load %arg2[%c0_1, %c0_2] : memref<64x20xbf16, #tpu.memory_space<vmem>>, vector<64x20xbf16>
    %cst = arith.constant dense<0.000000e+00> : vector<16x20xf32>
    %3 = tpu.matmul %1, %2, %cst {dimension_numbers = #tpu.dot_dimension_numbers<[1], [0], [0], [1], [0, 0, 1, 1], [], []>} : vector<16x64xbf16>, vector<64x20xbf16>, vector<16x20xf32> -> vector<16x20xf32>
    %c0_3 = arith.constant 0 : index
    %c0_4 = arith.constant 0 : index
    %4 = vector.load %arg3[%c0_3, %c0_4] : memref<1x20xf32, #tpu.memory_space<vmem>>, vector<1x20xf32>
    %5 = vector.broadcast %4 : vector<1x20xf32> to vector<16x20xf32>
    %6 = arith.addf %3, %5 : vector<16x20xf32>
    %7 = arith.negf %6 : vector<16x20xf32>
    %8 = math.exp %7 : vector<16x20xf32>
    %cst_5 = arith.constant 1.000000e+00 : f32
    %9 = vector.broadcast %cst_5 : f32 to vector<16x20xf32>
    %10 = arith.addf %9, %8 : vector<16x20xf32>
    %11 = arith.divf %9, %10 : vector<16x20xf32>
    %c0_6 = arith.constant 0 : index
    %c0_7 = arith.constant 0 : index
    %12 = vector.load %arg4[%c0_6, %c0_7] : memref<20x10xf32, #tpu.memory_space<vmem>>, vector<20x10xf32>
    %cst_8 = arith.constant dense<0.000000e+00> : vector<16x10xf32>
    %13 = tpu.matmul %11, %12, %cst_8 {dimension_numbers = #tpu.dot_dimension_numbers<[1], [0], [0], [1], [0, 0, 1, 1], [], []>} : vector<16x20xf32>, vector<20x10xf32>, vector<16x10xf32> -> vector<16x10xf32>
    %c0_9 = arith.constant 0 : index
    %c0_10 = arith.constant 0 : index
    %14 = vector.load %arg5[%c0_9, %c0_10] : memref<1x10xf32, #tpu.memory_space<vmem>>, vector<1x10xf32>
    %15 = vector.broadcast %14 : vector<1x10xf32> to vector<16x10xf32>
    %16 = arith.addf %13, %15 : vector<16x10xf32>
    %17 = arith.negf %16 : vector<16x10xf32>
    %18 = math.exp %17 : vector<16x10xf32>
    %cst_11 = arith.constant 1.000000e+00 : f32
    %19 = vector.broadcast %cst_11 : f32 to vector<16x10xf32>
    %20 = arith.addf %19, %18 : vector<16x10xf32>
    %21 = arith.divf %19, %20 : vector<16x10xf32>
    %c0_12 = arith.constant 0 : index
    %c0_13 = arith.constant 0 : index
    %22 = vector.load %arg6[%c0_12, %c0_13] : memref<10x20xf32, #tpu.memory_space<vmem>>, vector<10x20xf32>
    %cst_14 = arith.constant dense<0.000000e+00> : vector<16x20xf32>
    %23 = tpu.matmul %21, %22, %cst_14 {dimension_numbers = #tpu.dot_dimension_numbers<[1], [0], [0], [1], [0, 0, 1, 1], [], []>} : vector<16x10xf32>, vector<10x20xf32>, vector<16x20xf32> -> vector<16x20xf32>
    %c0_15 = arith.constant 0 : index
    %c0_16 = arith.constant 0 : index
    %24 = vector.load %arg7[%c0_15, %c0_16] : memref<1x20xf32, #tpu.memory_space<vmem>>, vector<1x20xf32>
    %25 = vector.broadcast %24 : vector<1x20xf32> to vector<16x20xf32>
    %26 = arith.addf %23, %25 : vector<16x20xf32>
    %27 = arith.negf %26 : vector<16x20xf32>
    %28 = math.exp %27 : vector<16x20xf32>
    %cst_17 = arith.constant 1.000000e+00 : f32
    %29 = vector.broadcast %cst_17 : f32 to vector<16x20xf32>
    %30 = arith.addf %29, %28 : vector<16x20xf32>
    %31 = arith.divf %29, %30 : vector<16x20xf32>
    %32 = arith.truncf %31 : vector<16x20xf32> to vector<16x20xbf16>
    %c0_18 = arith.constant 0 : index
    %c0_19 = arith.constant 0 : index
    %33 = vector.load %arg8[%c0_18, %c0_19] : memref<20x64xbf16, #tpu.memory_space<vmem>>, vector<20x64xbf16>
    %cst_20 = arith.constant dense<0.000000e+00> : vector<16x64xf32>
    %34 = tpu.matmul %32, %33, %cst_20 {dimension_numbers = #tpu.dot_dimension_numbers<[1], [0], [0], [1], [0, 0, 1, 1], [], []>} : vector<16x20xbf16>, vector<20x64xbf16>, vector<16x64xf32> -> vector<16x64xf32>
    %c0_21 = arith.constant 0 : index
    %c0_22 = arith.constant 0 : index
    %35 = vector.load %arg9[%c0_21, %c0_22] : memref<1x64xf32, #tpu.memory_space<vmem>>, vector<1x64xf32>
    %36 = vector.broadcast %35 : vector<1x64xf32> to vector<16x64xf32>
    %37 = arith.addf %34, %36 : vector<16x64xf32>
    %c0_23 = arith.constant 0 : index
    %c0_24 = arith.constant 0 : index
    %38 = vector.load %arg10[%c0_23, %c0_24] : memref<16x64xf32, #tpu.memory_space<vmem>>, vector<16x64xf32>
    tpu.vector_store %arg10[%c0_23, %c0_24], %37 {strides = array<i32>} : memref<16x64xf32, #tpu.memory_space<vmem>>, vector<16x64xf32>,
    return
  }
  func.func @transform_0(%arg0: i32) -> (i32, i32) {
    %c0_i32 = arith.constant 0 : i32
    %c0_i32_0 = arith.constant 0 : i32
    return %arg0, %c0_i32 : i32, i32
  }
  func.func @transform_1(%arg0: i32) -> (i32, i32) {
    %c0_i32 = arith.constant 0 : i32
    %c0_i32_0 = arith.constant 0 : i32
    %c0_i32_1 = arith.constant 0 : i32
    return %c0_i32, %c0_i32_0 : i32, i32
  }
  func.func @transform_2(%arg0: i32) -> (i32, i32) {
    %c0_i32 = arith.constant 0 : i32
    %c0_i32_0 = arith.constant 0 : i32
    %c0_i32_1 = arith.constant 0 : i32
    return %c0_i32, %c0_i32_0 : i32, i32
  }
  func.func @transform_3(%arg0: i32) -> (i32, i32) {
    %c0_i32 = arith.constant 0 : i32
    %c0_i32_0 = arith.constant 0 : i32
    %c0_i32_1 = arith.constant 0 : i32
    return %c0_i32, %c0_i32_0 : i32, i32
  }
  func.func @transform_4(%arg0: i32) -> (i32, i32) {
    %c0_i32 = arith.constant 0 : i32
    %c0_i32_0 = arith.constant 0 : i32
    %c0_i32_1 = arith.constant 0 : i32
    return %c0_i32, %c0_i32_0 : i32, i32
  }
  func.func @transform_5(%arg0: i32) -> (i32, i32) {
    %c0_i32 = arith.constant 0 : i32
    %c0_i32_0 = arith.constant 0 : i32
    %c0_i32_1 = arith.constant 0 : i32
    return %c0_i32, %c0_i32_0 : i32, i32
  }
  func.func @transform_6(%arg0: i32) -> (i32, i32) {
    %c0_i32 = arith.constant 0 : i32
    %c0_i32_0 = arith.constant 0 : i32
    %c0_i32_1 = arith.constant 0 : i32
    return %c0_i32, %c0_i32_0 : i32, i32
  }
  func.func @transform_7(%arg0: i32) -> (i32, i32) {
    %c0_i32 = arith.constant 0 : i32
    %c0_i32_0 = arith.constant 0 : i32
    %c0_i32_1 = arith.constant 0 : i32
    return %c0_i32, %c0_i32_0 : i32, i32
  }
  func.func @transform_8(%arg0: i32) -> (i32, i32) {
    %c0_i32 = arith.constant 0 : i32
    %c0_i32_0 = arith.constant 0 : i32
    %c0_i32_1 = arith.constant 0 : i32
    return %c0_i32, %c0_i32_0 : i32, i32
  }
  func.func @transform_9(%arg0: i32) -> (i32, i32) {
    %c0_i32 = arith.constant 0 : i32
    %c0_i32_0 = arith.constant 0 : i32
    return %arg0, %c0_i32 : i32, i32
  }
}

</mosaic_0001>

<bundles_post_ra>
// kernel: tpu_custom_call.1
= control target key start
LH: loop header
LB: loop body
LE: loop exit
PB: predicated region body
PF: predicated region fallthrough
CT: control target
= control target key end

     0   :  { %14 = vsyncpa [#allocation3], 0  ;;  %s1080_s0 = inlined_call_operand.vmem [shape: f32[32,64], index: 0, kind: input, shape index: {}]   ;;  %s1081_s1 = inlined_call_operand.vmem [shape: bf16[64,20], index: 1, kind: input, shape index: {}]   ;;  %s1082_s2 = inlined_call_operand.vmem [shape: f32[1,20], index: 2, kind: input, shape index: {}]   ;;  %s1083_s3 = inlined_call_operand.vmem [shape: f32[20,10], index: 3, kind: input, shape index: {}]   ;;  %s1084_s4 = inlined_call_operand.vmem [shape: f32[1,10], index: 4, kind: input, shape index: {}]   ;;  %s1085_s5 = inlined_call_operand.vmem [shape: f32[10,20], index: 5, kind: input, shape index: {}]   ;;  %s1086_s6 = inlined_call_operand.vmem [shape: f32[1,20], index: 6, kind: input, shape index: {}]   ;;  %s1087_s7 = inlined_call_operand.vmem [shape: bf16[20,64], index: 7, kind: input, shape index: {}]   ;;  %s1088_s8 = inlined_call_operand.vmem [shape: f32[1,64], index: 8, kind: input, shape index: {}]   ;;  %s1089_s9 = inlined_call_operand.hbm [shape: f32[32,64], index: 9, kind: output, shape index: {}]  }
   0x1   :  { %16 = vsyncpa [#allocation3 + $0x1], 0  ;;  %s941_s30 = smov 0   ;;  %s943_s10 = smov 0  }
   0x2   :  { %s945_s11 = smov 0   ;;  %s947_s12 = smov 0  }
   0x3 LB: > { %s962_s13 = sadd.s32 4294967295, %s887_s12   ;;  %s704_s14 = sadd.s32 4294967294, %s887_s12   ;;  %s887_s12 = sphi %s947_s12, %s1095_s12   ;;  %s883_s11 = sphi %s945_s11, %s1094_s11   ;;  %s879_s10 = sphi %s943_s10, %s1093_s10   ;;  %s875_s30 = sphi %s941_s30, %s1092_s30  }
   0x4   : > { %s966_s15 = sadd.s32 1, %s887_s12   ;;  %s223_s16 = sadd.s32 1, %s883_s11 }
   0x5   : > { %s220_s17 = ssub.s32 %s887_s12, %s966_s15  ;;  %p233_p0 = scmp.ne.s32.totalorder %s883_s11, %s879_s10 }
   0x6   : > { %p221_p1 = scmp.eq.s32.totalorder %s220_s17, 0  ;;  %p234_p2 = scmp.eq.s32.totalorder %s962_s13, 1 }
   0x7   : > { %p239_p3 = scmp.ne.s32.totalorder %s879_s10, %s875_s30  ;;  %p240_p4 = scmp.eq.s32.totalorder %s704_s14, 1 }
   0x8   : > { %s977_s18 = scalar_select %p221_p1, %s883_s11, %s223_s16  }
   0x9   : > { %p979_p5 = por %p234_p2, %p233_p0  ;;  %p983_p6 = por %p240_p4, %p239_p3 }
   0xa   : > { %p707_p7 = scmp.ge.s32.totalorder %s887_s12, 1  ;;  %p291_p8 = scmp.lt.s32.totalorder %s887_s12, 3 }
   0xc   : > { %p292_p9 = pnand %p707_p7, %p291_p8 }
   0xd   : > { %s709_s23 = sshll.u32 (!%p292_p9), %s962_s13, 1  ;;  %s324_s14 = sand.u32 (!%p292_p9), 1, %s879_s10  }
   0xe   : > { %295 = sbr.rel (%p292_p9) target bundleno = 665 (0x299), region = 56  ;;  %p328_p10 = scmp.lt.s32.totalorder (!%p292_p9), %s709_s23, 3 }
   0xf   : > { %s755_s22 = sshll.u32 (!%p292_p9), %s962_s13, 4  ;;  %s627_s29 = scalar_lea.sflag (!%p292_p9), [#allocation3], %s324_s14 }
  0x10   : > { %s638_s25 = scalar_lea.hbm (!%p292_p9), %s1089_s9, %s755_s22  ;;  %s845_s22 = scalar_lea.hbm (!%p292_p9), %s1089_s9, 32 }
  0x11   : > { %s641_s28 = sshll.u32 (!%p292_p9), %s638_s25, 4  ;;  %s642_s28 = int_to_ptr.hbm [resolvable:$true] %s641_s28 }
  0x12   : > { %s839_s13 = sshra.s32 (!%p292_p9), %s642_s28, 4  ;;  %s840_s13 = int_to_ptr.hbm [resolvable:$true] %s839_s13 }
  0x13   : > { %v753_v0 = vld [vmem:[%s1081_s1 + $0x18] sm:$0xff]  ;;  %v752_v1 = vld [vmem:[%s1081_s1 + $0x10] sm:$0xff]  ;;  %s1097_s23 = smov (!%p328_p10, %s709_s23), 3  ;;  %v751_v2 = vld [vmem:[%s1081_s1 + $0x8] sm:$0xff]  ;;  %vm374_vm0 = vcmask 523264   ;;  %vm444_vm1 = vcmask 1043456   ;;  %p846_p0 = scmp.lt.s32.totalorder %s840_s13, %s1089_s9 }
  0x14   : > { %382 = vmatpush.bf16.msra.mxu0 %v753_v0  ;;  %s710_s26 = sshll.u32 %s1097_s23, 3  ;;  %v750_v3 = vld [vmem:[%s1081_s1] sm:$0xff]  ;;  %v432_v7 = vld [vmem:[%s1083_s3 + $0x10] sm:$0xf]  ;;  %v431_v8 = vld [vmem:[%s1083_s3 + $0x8] sm:$0xff]  ;;  %vm437_vm5 = vcmask 162816  }
  0x15   : > { %s331_s16 = scalar_lea.vmem %s1080_s0, %s710_s26  ;;  %730 = vmatpush.msk.msra.mxu1 %vm444_vm1, %v432_v7  ;;  %v430_v9 = vld [vmem:[%s1083_s3] sm:$0xff]  ;;  %v510_v41 = vld [vmem:[%s1085_s5 + $0x8] sm:$0x3]  ;;  %vm522_vm11 = vcmask 1041408   ;;  %vm515_vm15 = vcmask 80896   ;;  %s841_s17 = scalar_lea.hbm %s840_s13, 16 }
  0x16   : > { %v335_v4 = vld [vmem:[%s331_s16] sm:$0xff]  ;;  %v336_v5 = vld [vmem:[%s331_s16 + $0x8] sm:$0xff]  ;;  %735 = vmatpush.msk.msra.mxu2 %vm522_vm11, %v510_v41  ;;  %s708_s16 = sshll.u32 %s324_s14, 4  ;;  %p842_p11 = scmp.ne.s32.totalorder %s840_s13, %s841_s17 }
  0x17   : > { %v337_v6 = vpack.c.bf16 %v336_v5, %v335_v4  ;;  %462 = vmatpush.msra.mxu1 %v431_v8  ;;  %v797_v10 = vld [vmem:[%s1082_s2] ss:$0 sm:$0xff]  ;;  %s326_s26 = scalar_lea.vmem [#allocation2], %s708_s16  ;;  %p847_p1 = scmp.lt.s32.totalorder %s845_s22, %s841_s17 }
  0x18   : > { %383 = vmatpush.bf16.msra.mxu0 %v752_v1  ;;  %v509_v42 = vld [vmem:[%s1085_s5] sm:$0xff]  ;;  %s639_s27 = sshll.u32 %s326_s26, 4  ;;  %p843_p12 = pnand %p842_p11, %p979_p5  ;;  %s640_s27 = int_to_ptr.vmem [resolvable:$true] %s639_s27 }
  0x19   : > { %463 = vmatpush.msra.mxu1 %v430_v9  ;;  %541 = vmatpush.msra.mxu2 %v509_v42  ;;  %v798_v43 = vld [vmem:[%s1084_s4] ss:$0 sm:$0xff]  ;;  %p848_p2 = por %p847_p1, %p846_p0 }
  0x1a   : > { %p844_p13 = pneg %p843_p12 }
  0x1c   : > { %384 = vmatpush.bf16.msra.mxu0 %v751_v2  ;;  %p849_p3 = pnand %p848_p2, %p844_p13 }
  0x20   : > { %385 = vmatpush.bf16.msra.mxu0 %v750_v3 }
  0x23   : > { %727 = vmatmul.msk.bf16.vlgmr.msra.gmra.mxu0 %vm374_vm0, %v337_v6 }
  0xa0   : > { %v387_v11 = vpop.f32.mrf.mxu0 }
  0xa1   : > { %v388_v12 = vadd.f32 %v797_v10, %v387_v11  ;;  %v799_v11 = vld [vmem:[%s1086_s6] ss:$0 sm:$0xff] }
  0xa3   : > { %v728_v13 = vmul.f32 -1.442695, %v388_v12 }
  0xa5   : > { %801 = vpow2.f32 %v728_v13 }
  0xa8   : > { %v389_v14 = vpop.f32.mrf.mxu0 }
  0xa9   : > { %v390_v15 = vadd.f32 %v797_v10, %v389_v14  ;;  %v590_v10 = vld [vmem:[%s1087_s7 + $0x8] sm:$0x3] }
  0xaa   : > { %v600_v12 = vunpack.c.l.b16 %v590_v10 }
  0xab   : > { %v802_v16 = vpop.eup %801  ;;  %v729_v17 = vmul.f32 -1.442695, %v390_v15 }
  0xac   : > { %v398_v18 = vadd.f32 1.0, %v802_v16  ;;  %v602_v13 = vpack.c.b16 %v600_v12, %v600_v12 }
  0xad   : > { %803 = vpow2.f32 %v729_v17  ;;  %v754_v17 = vld [vmem:[%s1087_s7] sm:$0xff] }
  0xae   : > { %805 = vrcp.f32 %v398_v18  ;;  %v411_v24 = vand.u32 2147483648, %v398_v18  ;;  %v409_v26 = vand.u32 2147483647, %v398_v18  ;;  %vm405_vm3 = vweird.f32 %v398_v18 }
  0xaf   : > { %v608_v16 = vsel %vm522_vm11, %v602_v13, 0 }
  0xb0   : > { %v412_v29 = vor.u32 1.1754944e-38, %v411_v24  ;;  %vm410_vm6 = vcmp.eq.f32.partialorder %v409_v26, 8.507059e+37  ;;  %616 = vmatpush.bf16.msra.mxu3 %v608_v16 }
  0xb3   : > { %v804_v19 = vpop.eup %803 }
  0xb4   : > { %v806_v20 = vpop.eup %805  ;;  %v399_v21 = vadd.f32 1.0, %v804_v19  ;;  %617 = vmatpush.bf16.msra.mxu3 %v754_v17 }
  0xb5   : > { %v401_v22 = vmul.f32 %v806_v20, %v398_v18  ;;  %vm406_vm2 = vweird.f32 %v806_v20 }
  0xb6   : > { %807 = vrcp.f32 %v399_v21  ;;  %vm407_vm4 = vmor %vm405_vm3, %vm406_vm2  ;;  %v426_v34 = vand.u32 2147483648, %v399_v21  ;;  %v424_v36 = vand.u32 2147483647, %v399_v21  ;;  %vm420_vm8 = vweird.f32 %v399_v21 }
  0xb7   : > { %v402_v23 = vsub.f32 1.0, %v401_v22 }
  0xb8   : > { %v427_v38 = vor.u32 1.1754944e-38, %v426_v34  ;;  %vm425_vm10 = vcmp.eq.f32.partialorder %v424_v36, 8.507059e+37 }
  0xb9   : > { %v403_v25 = vmul.f32 %v806_v20, %v402_v23 }
  0xbb   : > { %v404_v27 = vadd.f32 %v806_v20, %v403_v25 }
  0xbc   : > { %v808_v28 = vpop.eup %807 }
  0xbd   : > { %v408_v30 = vsel %vm407_vm4, %v806_v20, %v404_v27  ;;  %v416_v31 = vmul.f32 %v808_v28, %v399_v21  ;;  %vm421_vm7 = vweird.f32 %v808_v28 }
  0xbe   : > { %v413_v32 = vsel %vm410_vm6, %v412_v29, %v408_v30  ;;  %vm422_vm9 = vmor %vm420_vm8, %vm421_vm7 }
  0xbf   : > { %731 = vmatmul.msk.f32.vlgmr.msra.gmra.mxu1 %vm437_vm5, %v413_v32  ;;  %v417_v33 = vsub.f32 1.0, %v416_v31 }
  0xc1   : > { %v418_v35 = vmul.f32 %v808_v28, %v417_v33 }
  0xc3   : > { %v419_v37 = vadd.f32 %v808_v28, %v418_v35 }
  0xc5   : > { %v423_v39 = vsel %vm422_vm9, %v808_v28, %v419_v37 }
  0xc6   : > { %v428_v40 = vsel %vm425_vm10, %v427_v38, %v423_v39 }
  0xc7   : > { %732 = vmatmul.msk.f32.gmra.mxu1 %vm437_vm5, %v428_v40 }
 0x13c   : > { %v465_v44 = vpop.f32.mrf.mxu1 }
 0x13d   : > { %v466_v45 = vadd.f32 %v798_v43, %v465_v44 }
 0x13f   : > { %v733_v46 = vmul.f32 -1.442695, %v466_v45 }
 0x141   : > { %809 = vpow2.f32 %v733_v46 }
 0x144   : > { %v468_v47 = vpop.f32.mrf.mxu1 }
 0x145   : > { %v469_v48 = vadd.f32 %v798_v43, %v468_v47  ;;  %v800_v47 = vld [vmem:[%s1088_s8] ss:$0 sm:$0xff] }
 0x147   : > { %v810_v49 = vpop.eup %809  ;;  %v734_v50 = vmul.f32 -1.442695, %v469_v48 }
 0x148   : > { %v477_v51 = vadd.f32 1.0, %v810_v49 }
 0x149   : > { %811 = vpow2.f32 %v734_v50 }
 0x14a   : > { %813 = vrcp.f32 %v477_v51  ;;  %v490_v57 = vand.u32 2147483648, %v477_v51  ;;  %v488_v59 = vand.u32 2147483647, %v477_v51  ;;  %vm484_vm13 = vweird.f32 %v477_v51 }
 0x14c   : > { %v491_v62 = vor.u32 1.1754944e-38, %v490_v57  ;;  %vm489_vm1 = vcmp.eq.f32.partialorder %v488_v59, 8.507059e+37 }
 0x14f   : > { %v812_v52 = vpop.eup %811 }
 0x150   : > { %v814_v53 = vpop.eup %813  ;;  %v478_v54 = vadd.f32 1.0, %v812_v52 }
 0x151   : > { %v480_v55 = vmul.f32 %v814_v53, %v477_v51  ;;  %vm485_vm12 = vweird.f32 %v814_v53 }
 0x152   : > { %815 = vrcp.f32 %v478_v54  ;;  %vm486_vm14 = vmor %vm484_vm13, %vm485_vm12  ;;  %v505_v3 = vand.u32 2147483648, %v478_v54  ;;  %v503_v5 = vand.u32 2147483647, %v478_v54  ;;  %vm499_vm3 = vweird.f32 %v478_v54 }
 0x153   : > { %v481_v56 = vsub.f32 1.0, %v480_v55 }
 0x154   : > { %v506_v7 = vor.u32 1.1754944e-38, %v505_v3  ;;  %vm504_vm6 = vcmp.eq.f32.partialorder %v503_v5, 8.507059e+37 }
 0x155   : > { %v482_v58 = vmul.f32 %v814_v53, %v481_v56 }
 0x157   : > { %v483_v60 = vadd.f32 %v814_v53, %v482_v58 }
 0x158   : > { %v816_v61 = vpop.eup %815 }
 0x159   : > { %v487_v63 = vsel %vm486_vm14, %v814_v53, %v483_v60  ;;  %v495_v0 = vmul.f32 %v816_v61, %v478_v54  ;;  %vm500_vm2 = vweird.f32 %v816_v61 }
 0x15a   : > { %v492_v1 = vsel %vm489_vm1, %v491_v62, %v487_v63  ;;  %vm501_vm4 = vmor %vm499_vm3, %vm500_vm2 }
 0x15b   : > { %736 = vmatmul.msk.f32.vlgmr.msra.gmra.mxu2 %vm515_vm15, %v492_v1  ;;  %v496_v2 = vsub.f32 1.0, %v495_v0 }
 0x15d   : > { %v497_v4 = vmul.f32 %v816_v61, %v496_v2 }
 0x15f   : > { %v498_v6 = vadd.f32 %v816_v61, %v497_v4 }
 0x161   : > { %v502_v8 = vsel %vm501_vm4, %v816_v61, %v498_v6 }
 0x162   : > { %v507_v9 = vsel %vm504_vm6, %v506_v7, %v502_v8 }
 0x163   : > { %737 = vmatmul.msk.f32.gmra.mxu2 %vm515_vm15, %v507_v9 }
 0x1de   : > { %v543_v14 = vpop.f32.mrf.mxu2 }
 0x1df   : > { %v544_v15 = vadd.f32 %v799_v11, %v543_v14 }
 0x1e1   : > { %v738_v18 = vmul.f32 -1.442695, %v544_v15 }
 0x1e3   : > { %817 = vpow2.f32 %v738_v18 }
 0x1e6   : > { %v546_v19 = vpop.f32.mrf.mxu2 }
 0x1e7   : > { %v547_v20 = vadd.f32 %v799_v11, %v546_v19 }
 0x1e9   : > { %v818_v21 = vpop.eup %817  ;;  %v739_v22 = vmul.f32 -1.442695, %v547_v20 }
 0x1ea   : > { %v555_v23 = vadd.f32 1.0, %v818_v21 }
 0x1eb   : > { %819 = vpow2.f32 %v739_v22 }
 0x1ec   : > { %821 = vrcp.f32 %v555_v23  ;;  %vm562_vm8 = vweird.f32 %v555_v23  ;;  %v568_v34 = vand.u32 2147483648, %v555_v23  ;;  %v566_v36 = vand.u32 2147483647, %v555_v23 }
 0x1ee   : > { %v569_v41 = vor.u32 1.1754944e-38, %v568_v34  ;;  %vm567_vm13 = vcmp.eq.f32.partialorder %v566_v36, 8.507059e+37 }
 0x1f1   : > { %v820_v24 = vpop.eup %819 }
 0x1f2   : > { %v822_v25 = vpop.eup %821  ;;  %v556_v26 = vadd.f32 1.0, %v820_v24 }
 0x1f3   : > { %v558_v27 = vmul.f32 %v822_v25, %v555_v23  ;;  %vm563_vm7 = vweird.f32 %v822_v25 }
 0x1f4   : > { %823 = vrcp.f32 %v556_v26  ;;  %v583_v35 = vand.u32 2147483648, %v556_v26  ;;  %v581_v38 = vand.u32 2147483647, %v556_v26  ;;  %vm564_vm10 = vmor %vm562_vm8, %vm563_vm7  ;;  %vm577_vm11 = vweird.f32 %v556_v26 }
 0x1f5   : > { %v559_v28 = vsub.f32 1.0, %v558_v27 }
 0x1f6   : > { %v584_v42 = vor.u32 1.1754944e-38, %v583_v35  ;;  %vm582_vm14 = vcmp.eq.f32.partialorder %v581_v38, 8.507059e+37 }
 0x1f7   : > { %v560_v29 = vmul.f32 %v822_v25, %v559_v28 }
 0x1f9   : > { %v561_v32 = vadd.f32 %v822_v25, %v560_v29 }
 0x1fa   : > { %v824_v30 = vpop.eup %823 }
 0x1fb   : > { %v573_v31 = vmul.f32 %v824_v30, %v556_v26  ;;  %vm578_vm9 = vweird.f32 %v824_v30  ;;  %v565_v39 = vsel %vm564_vm10, %v822_v25, %v561_v32 }
 0x1fc   : > { %vm579_vm12 = vmor %vm577_vm11, %vm578_vm9  ;;  %v570_v44 = vsel %vm567_vm13, %v569_v41, %v565_v39 }
 0x1fd   : > { %v574_v33 = vsub.f32 1.0, %v573_v31 }
 0x1ff   : > { %v575_v37 = vmul.f32 %v824_v30, %v574_v33 }
 0x201   : > { %v576_v40 = vadd.f32 %v824_v30, %v575_v37 }
 0x203   : > { %v580_v43 = vsel %vm579_vm12, %v824_v30, %v576_v40 }
 0x204   : > { %v585_v45 = vsel %vm582_vm14, %v584_v42, %v580_v43 }
 0x205   : > { %v587_v46 = vpack.c.bf16 %v585_v45, %v570_v44 }
 0x207   : > { %744 = vmatmul.msk.bf16.vlgmr.msra.gmra.mxu3 %vm437_vm5, %v587_v46 }
 0x28a   : > { %v619_v48 = vpop.f32.mrf.mxu3 }
 0x28b   : > { %v620_v49 = vadd.f32 %v800_v47, %v619_v48 }
 0x28d   : > { %624 = vst.msk [vmem:[%s326_s26] sm:$0xff] %vm374_vm0, %v620_v49 }
 0x292   : > { %v621_v50 = vpop.f32.mrf.mxu3 }
 0x293   : > { %v622_v51 = vadd.f32 %v800_v47, %v621_v50 }
 0x295   : > { %625 = vst.msk [vmem:[%s326_s26 + $0x8] sm:$0xff] %vm374_vm0, %v622_v51 }
 0x296   : > { %852 = shalt.err (!%p849_p3)
}
 0x297   : > { %s889_s14 = smov 128   ;;  %s890_s25 = smov 8  }
 0x298   : > { %756 = dma.vmem_to_hbm [thread:$0]  (%p979_p5), %s640_s27, 256, %s642_s28, %s627_s29, %s889_s14, %s889_s14, %s890_s25  }
 0x299 PF: > { %p762_p4 = scmp.ge.s32.totalorder %s887_s12, 2  ;;  %s656_s26 = sand.u32 1, %s875_s30  }
 0x29a   : > { %s657_s21 = scalar_lea.sflag [#allocation3], %s656_s26 }
 0x29b   : > { %p759_p7 = pnand %p762_p4, %p983_p6 }
 0x29d   : > { %p760_p8 = pneg %p759_p7 }
 0x29f   : > { %870 = dma.done.wait (%p760_p8), %s657_s21, 256  }
 0x2a0   : > { %872 = vsyncadd (%p760_p8), %s657_s21, 4294967040  ;;  %p19_p9 = scmp.ge.s32.totalorder %s966_s15, 4   ;;  %s1092_s30 = smov %s879_s10 }
 0x2a1   : > { %s1093_s10 = smov %s883_s11  ;;  %s1094_s11 = smov %s977_s18 }
 0x2a2   : > { %s1095_s12 = smov %s966_s15  ;;  %21 = sbr.rel (!%p19_p9) target bundleno = 3 (0x3), region = 91 }
 0x2a7   :  { %663 = vsyncpa [#allocation3], 1 }
 0x2a8   :  { %665 = vsyncpa [#allocation3 + $0x1], 1 }

</bundles_post_ra>
